<compile_context>
chip_gen: v6e
topology: v6e:2x2x1
jax: 0.10.0
libtpu: 0.0.40
codegen_flags: <defaults>
</compile_context>

<pallas_src>
import numpy as np
import jax
import jax.numpy as jnp
from jax.experimental import pallas as pl
from jax.experimental.pallas import tpu as pltpu


def _stacked_shifted_dft(n: int, dtype) -> jax.Array:
    """(2N, N) matrix: rows [0:N] = Re, rows [N:2N] = Im of the DFT matrix
    with fftshift folded into the row (output-frequency) permutation:
    fftshift(X)[k'] = X[(k' - n//2) mod n]."""
    kk = (np.arange(n) - n // 2) % n
    ang = -2.0 * np.pi * np.outer(kk, np.arange(n)) / n        # (n, n)
    w = np.concatenate([np.cos(ang), np.sin(ang)], axis=0)     # (2n, n)
    return jnp.asarray(w.astype(np.float32)).astype(dtype)


def _choose_lane_chunk(n: int, total_lanes: int) -> int:
    """Lane-chunk TC: power-of-two multiple of 128.

    Big chunks amortize per-grid-step pipeline overhead and give unmasked,
    lane-dense stores; capped so double-buffered (in + out) f32 blocks stay
    well under the scoped-VMEM budget on every generation (v5e default scoped
    limit is 16 MiB, v7x physical VMEM is 64 MiB); shrunk so the grid keeps
    >= 2 steps so both v7x TensorCores get work.
    """
    vmem_budget = 16 * 1024 * 1024
    max_tc = vmem_budget // (4 * 4 * max(n, 1))   # 2 bufs * (in + out) * 4 B
    tc = 4096
    while tc > 128 and (tc > max_tc or -(-total_lanes // tc) < 2):
        tc //= 2
    return tc


def _doppler_kernel(w_ref, x_ref, o_ref):
    # w_ref: (2N, N) stacked [Re; Im] twiddles (resident across the grid)
    # x_ref: (N, TC) activation chunk   o_ref: (N, TC) magnitudes
    n = w_ref.shape[1]
    w = w_ref[...]
    x = x_ref[...].astype(w.dtype)                 # optional bf16 operand path
    y = jnp.dot(w, x, preferred_element_type=jnp.float32)     # (2N, TC) f32
    re = y[:n, :]
    im = y[n:, :]
    o_ref[...] = jnp.sqrt(re * re + im * im)


def doppler_map_batch(x: jax.Array, *, compute_dtype=jnp.float32) -> jax.Array:
    """Pallas equivalent of DopplerMapBatch.forward for real-valued input."""
    assert x.ndim == 5, "expected a 5-D tensor"
    # TODO(synk): complex-valued input (torch.fft.fft also accepts complex) is
    # not implemented; real-valued radar cubes are assumed.
    b, d1, d2, n, s = x.shape
    m = b * d1 * d2
    total = m * s

    x = x.astype(jnp.float32)
    w = _stacked_shifted_dft(n, compute_dtype)                 # (2n, n)

    # Lane-dense layout: FFT axis on sublanes, everything else fused on lanes.
    x2 = jnp.transpose(x.reshape(m, n, s), (1, 0, 2)).reshape(n, total)

    tc = _choose_lane_chunk(n, total)
    grid_len = -(-total // tc)                                 # ceil-div
    total_pad = grid_len * tc
    if total_pad != total:
        x2 = jnp.pad(x2, ((0, 0), (0, total_pad - total)))

    w_bytes = 2 * n * n * jnp.dtype(compute_dtype).itemsize
    cost = pl.CostEstimate(
        flops=int(2 * (2 * n) * n * total_pad + 3 * n * total_pad),
        transcendentals=int(n * total_pad),
        bytes_accessed=int(2 * 4 * n * total_pad + w_bytes),
    )

    out2 = pl.pallas_call(
        _doppler_kernel,
        out_shape=jax.ShapeDtypeStruct((n, total_pad), jnp.float32),
        grid_spec=pltpu.PrefetchScalarGridSpec(
            num_scalar_prefetch=0,
            grid=(grid_len,),
            in_specs=[
                # Constant block index -> twiddles fetched once, held resident.
                pl.BlockSpec((2 * n, n), lambda i: (0, 0)),
                pl.BlockSpec((n, tc), lambda i: (0, i)),
            ],
            out_specs=pl.BlockSpec((n, tc), lambda i: (0, i)),
        ),
        compiler_params=pltpu.CompilerParams(
            dimension_semantics=("parallel",),
            vmem_limit_bytes=48 * 1024 * 1024,
        ),
        cost_estimate=cost,
    )(w, x2)

    out = out2[:, :total].reshape(n, m, s)
    return jnp.transpose(out, (1, 0, 2)).reshape(b, d1, d2, n, s)


if __name__ == "__main__":
    key = jax.random.PRNGKey(0)
    # (batch, frames, antennas, chirps=N (fft dim), samples)
    B, D1, D2, N, S = 2, 3, 2, 16, 32
    x = jax.random.normal(key, (B, D1, D2, N, S), dtype=jnp.float32)

    fwd = jax.jit(doppler_map_batch, static_argnames=("compute_dtype",))

    # f32 operand path (default) — tight tolerance vs. jnp.fft reference.
    out = jax.block_until_ready(fwd(x))
    ref = jnp.abs(jnp.fft.fftshift(jnp.fft.fft(x, axis=3), axes=3))
    np.testing.assert_allclose(np.asarray(out), np.asarray(ref),
                               rtol=2e-3, atol=2e-3)

    # bf16 operand path (v6e/v7x MXU-native) — looser tolerance by design.
    out_bf16 = jax.block_until_ready(fwd(x, compute_dtype=jnp.bfloat16))
    np.testing.assert_allclose(np.asarray(out_bf16), np.asarray(ref),
                               rtol=5e-2, atol=1.5e-1)

    print("KERNEL_OK")
</pallas_src>

<mosaic_0001>
module attributes {stable_mosaic.version = 11 : i64} {
  func.func @_doppler_kernel(%arg0: i32, %arg1: memref<32x16xf32, #tpu.memory_space<vmem>>, %arg2: memref<16x256xf32, #tpu.memory_space<vmem>>, %arg3: memref<16x256xf32, #tpu.memory_space<vmem>>) attributes {dimension_semantics = [#tpu.dimension_semantics<parallel>], iteration_bounds = array<i64: 2>, scalar_prefetch = 0 : i64, scratch_operands = 0 : i64, tpu.core_type = #tpu.core_type<tc>, window_params = [{pipeline_mode = #tpu.pipeline_mode<synchronous>, transform_indices = @transform_0, window_bounds = array<i64: 32, 16>}, {transform_indices = @transform_1, window_bounds = array<i64: 16, 256>}, {transform_indices = @transform_2, window_bounds = array<i64: 16, 256>}]} {
    %c0 = arith.constant 0 : index
    %c0_0 = arith.constant 0 : index
    %0 = vector.load %arg1[%c0, %c0_0] : memref<32x16xf32, #tpu.memory_space<vmem>>, vector<32x16xf32>
    %c0_1 = arith.constant 0 : index
    %c0_2 = arith.constant 0 : index
    %1 = vector.load %arg2[%c0_1, %c0_2] : memref<16x256xf32, #tpu.memory_space<vmem>>, vector<16x256xf32>
    %cst = arith.constant dense<0.000000e+00> : vector<32x256xf32>
    %2 = tpu.matmul %0, %1, %cst {dimension_numbers = #tpu.dot_dimension_numbers<[1], [0], [0], [1], [0, 0, 1, 1], [], []>} : vector<32x16xf32>, vector<16x256xf32>, vector<32x256xf32> -> vector<32x256xf32>
    %3 = vector.extract_strided_slice %2 {offsets = [0, 0], sizes = [16, 256], strides = [1, 1]} : vector<32x256xf32> to vector<16x256xf32>
    %4 = vector.extract_strided_slice %2 {offsets = [16, 0], sizes = [16, 256], strides = [1, 1]} : vector<32x256xf32> to vector<16x256xf32>
    %5 = arith.mulf %3, %3 : vector<16x256xf32>
    %6 = arith.mulf %4, %4 : vector<16x256xf32>
    %7 = arith.addf %5, %6 : vector<16x256xf32>
    %8 = math.sqrt %7 : vector<16x256xf32>
    %c0_3 = arith.constant 0 : index
    %c0_4 = arith.constant 0 : index
    %9 = vector.load %arg3[%c0_3, %c0_4] : memref<16x256xf32, #tpu.memory_space<vmem>>, vector<16x256xf32>
    tpu.vector_store %arg3[%c0_3, %c0_4], %8 {strides = array<i32>} : memref<16x256xf32, #tpu.memory_space<vmem>>, vector<16x256xf32>,
    return
  }
  func.func @transform_0(%arg0: i32) -> (i32, i32) {
    %c0_i32 = arith.constant 0 : i32
    %c0_i32_0 = arith.constant 0 : i32
    %c0_i32_1 = arith.constant 0 : i32
    return %c0_i32, %c0_i32_0 : i32, i32
  }
  func.func @transform_1(%arg0: i32) -> (i32, i32) {
    %c0_i32 = arith.constant 0 : i32
    %c0_i32_0 = arith.constant 0 : i32
    return %c0_i32, %arg0 : i32, i32
  }
  func.func @transform_2(%arg0: i32) -> (i32, i32) {
    %c0_i32 = arith.constant 0 : i32
    %c0_i32_0 = arith.constant 0 : i32
    return %c0_i32, %arg0 : i32, i32
  }
}

</mosaic_0001>

<bundles_post_ra>
// kernel: doppler_map_batch.1
= control target key start
LH: loop header
LB: loop body
LE: loop exit
PB: predicated region body
PF: predicated region fallthrough
CT: control target
= control target key end

     0   :  { %s507_s9 = smov 0   ;;  %s509_s10 = smov 0   ;;  %s593_s0 = inlined_call_operand.vmem [shape: f32[32,16], index: 0, kind: input, shape index: {}]   ;;  %s594_s1 = inlined_call_operand.vmem [shape: f32[16,512], index: 1, kind: input, shape index: {}]   ;;  %s595_s2 = inlined_call_operand.vmem [shape: f32[16,512], index: 2, kind: output, shape index: {}]  }
   0x1   :  { %s511_s11 = smov 0  }
   0x2 LB: > { %s409_s12 = sadd.s32 4294967295, %s489_s11   ;;  %s524_s13 = sadd.s32 1, %s489_s11   ;;  %s489_s11 = sphi %s511_s11, %s599_s11   ;;  %s485_s10 = sphi %s509_s10, %s598_s10   ;;  %s481_s9 = sphi %s507_s9, %s597_s9  }
   0x3   : > { %s37_s14 = ssub.s32 %s489_s11, %s524_s13  ;;  %s40_s15 = sadd.s32 1, %s485_s10 }
   0x4   : > { %p38_p0 = scmp.eq.s32.totalorder %s37_s14, 0  ;;  %p47_p1 = scmp.ne.s32.totalorder %s485_s10, %s481_s9 }
   0x5   : > { %p48_p2 = scmp.eq.s32.totalorder %s489_s11, 0  ;;  %p77_p3 = scmp.eq.s32.totalorder %s409_s12, 1 }
   0x6   : > { %s535_s16 = scalar_select %p38_p0, %s485_s10, %s40_s15  }
   0x7   : > { %p49_p4 = por %p48_p2, %p47_p1  ;;  %p537_p5 = por %p77_p3, %p47_p1 }
   0x8   : > { %p412_p6 = scmp.ge.s32.totalorder %s489_s11, 2 }
   0xa   : > { %102 = sbr.rel (%p412_p6) target bundleno = 21 (0x15), region = 20 }
   0xf   : > { %105 = sbr.rel (!%p49_p4) target bundleno = 21 (0x15), region = 24  ;;  %s107_s18 = sand.u32 (%p49_p4), 1, %s485_s10  }
  0x10   : > { %s428_s19 = sshll.u32 (%p49_p4), %s489_s11, 4  ;;  %s413_s20 = sshll.u32 (%p49_p4), %s107_s18, 5 }
  0x11   : > { %s112_s23 = scalar_lea.vmem (%p49_p4), %s594_s1, %s428_s19  ;;  %s109_s24 = scalar_lea.vmem (%p49_p4), [#allocation2], %s413_s20 }
  0x12   : > { %v125_v0 = vld [vmem:[%s112_s23] sm:$0xff] (%p49_p4)  ;;  %v127_v1 = vld [vmem:[%s112_s23 + $0x8] sm:$0xff] (%p49_p4) }
  0x13   : > { %v129_v2 = vld [vmem:[%s112_s23 + $0x20] sm:$0xff] (%p49_p4)  ;;  %126 = vst [vmem:[%s109_s24] sm:$0xff] (%p49_p4), %v125_v0  ;;  %128 = vst [vmem:[%s109_s24 + $0x8] sm:$0xff] (%p49_p4), %v127_v1  ;;  %v131_v3 = vld [vmem:[%s112_s23 + $0x28] sm:$0xff] (%p49_p4) }
  0x14   : > { %130 = vst [vmem:[%s109_s24 + $0x10] sm:$0xff] %v129_v2  ;;  %132 = vst [vmem:[%s109_s24 + $0x18] sm:$0xff] %v131_v3 }
  0x15 PF: > { %p416_p7 = scmp.ge.s32.totalorder %s489_s11, 1  ;;  %p137_p8 = scmp.lt.s32.totalorder %s489_s11, 3 }
  0x17   : > { %p138_p9 = pnand %p416_p7, %p137_p8 }
  0x18   : > { %s144_s25 = sand.u32 (!%p138_p9), 1, %s481_s9  }
  0x19   : > { %141 = sbr.rel (%p138_p9) target bundleno = 266 (0x10a), region = 47  ;;  %s550_s26 = sshll.u32 (!%p138_p9), %s144_s25, 5 }
  0x1a   : > { %s146_s27 = scalar_lea.vmem (!%p138_p9), [#allocation2], %s550_s26  ;;  %s566_s8 = scalar_lea.vmem (!%p138_p9), [#allocation3], %s550_s26 }
  0x1e   : > { %v491_v4 = vmov 0.0   ;;  %v173_v5 = vld [vmem:[%s146_s27 + $0x18] sm:$0xff]  ;;  %v172_v6 = vld [vmem:[%s146_s27 + $0x10] sm:$0xff]  ;;  %v171_v7 = vld [vmem:[%s146_s27 + $0x8] sm:$0xff]  ;;  %vm174_vm0 = vcmask 130048   ;;  %s429_s9 = sshll.u32 (%p537_p5), %s409_s12, 4 }
  0x1f   : > { %251 = vmatprep.mubr.f32.mxu0 %v491_v4  ;;  %263 = vmatprep.mubr.f32.mxu1 %v491_v4  ;;  %v170_v8 = vld [vmem:[%s146_s27] sm:$0xff]  ;;  %v168_v10 = vld [vmem:[%s593_s0 + $0x10] sm:$0xff]  ;;  %v167_v11 = vld [vmem:[%s593_s0 + $0x8] sm:$0xff]  ;;  %s329_s18 = scalar_lea.vmem (%p537_p5), %s595_s2, %s429_s9 }
  0x20   : > { %215 = vmatprep.subr.mxu0 %v173_v5  ;;  %430 = vmatprep.subr.mxu1 %v173_v5  ;;  %v166_v9 = vld [vmem:[%s593_s0] sm:$0xff]  ;;  %v169_v12 = vld [vmem:[%s593_s0 + $0x18] sm:$0xff] }
  0x21   : > { %216 = vmatpush1.msra.mxu0 %v172_v6  ;;  %432 = vmatpush1.msra.mxu1 %v172_v6 }
  0x22   : > { %217 = vmatprep.subr.mxu0 %v171_v7  ;;  %431 = vmatprep.subr.mxu1 %v171_v7 }
  0x23   : > { %218 = vmatpush1.msra.mxu0 %v170_v8  ;;  %433 = vmatpush1.msra.mxu1 %v170_v8 }
  0x24   : > { %419 = vmatmul.mubr.msk.f32.vlgmr.msra.gmra.mxu0 %vm174_vm0, %v166_v9  ;;  %421 = vmatmul.mubr.msk.f32.vlgmr.msra.gmra.mxu1 %vm174_vm0, %v168_v10 }
  0x25   : > { %257 = vmatprep.mubr.f32.mxu0 %v491_v4  ;;  %269 = vmatprep.mubr.f32.mxu1 %v491_v4 }
  0x28   : > { %420 = vmatmul.mubr.msk.f32.gmra.mxu0 %vm174_vm0, %v167_v11  ;;  %422 = vmatmul.mubr.msk.f32.gmra.mxu1 %vm174_vm0, %v169_v12 }
  0xe4   : > { %v253_v13 = vpop.f32.mrf.mxu0  ;;  %v265_v14 = vpop.f32.mrf.mxu1 }
  0xe5   : > { %v276_v15 = vmul.f32 %v253_v13, %v253_v13  ;;  %v280_v16 = vmul.f32 %v265_v14, %v265_v14 }
  0xe6   : > { %v255_v17 = vpop.f32.mrf.mxu0  ;;  %v267_v18 = vpop.f32.mrf.mxu1 }
  0xe7   : > { %v284_v19 = vadd.f32 %v280_v16, %v276_v15  ;;  %v277_v20 = vmul.f32 %v255_v17, %v255_v17  ;;  %v281_v21 = vmul.f32 %v267_v18, %v267_v18 }
  0xe8   : > { %v259_v22 = vpop.f32.mrf.mxu0  ;;  %v271_v23 = vpop.f32.mrf.mxu1 }
  0xe9   : > { %459 = vrsqrt.f32 %v284_v19  ;;  %v285_v24 = vadd.f32 %v281_v21, %v277_v20  ;;  %v278_v25 = vmul.f32 %v259_v22, %v259_v22  ;;  %v282_v26 = vmul.f32 %v271_v23, %v271_v23 }
  0xea   : > { %v261_v27 = vpop.f32.mrf.mxu0  ;;  %v273_v28 = vpop.f32.mrf.mxu1  ;;  %vm290_vm1 = vcmp.eq.f32.partialorder %v284_v19, inf  ;;  %v293_v35 = vand.u32 2147483648, %v284_v19  ;;  %vm292_vm2 = vcmp.eq.f32.partialorder %v284_v19, 0.0 }
  0xeb   : > { %v279_v29 = vmul.f32 %v261_v27, %v261_v27  ;;  %v283_v30 = vmul.f32 %v273_v28, %v273_v28  ;;  %461 = vrsqrt.f32 %v285_v24  ;;  %v286_v31 = vadd.f32 %v282_v26, %v278_v25 }
  0xec   : > { %vm297_vm3 = vcmp.eq.f32.partialorder %v285_v24, inf  ;;  %v300_v40 = vand.u32 2147483648, %v285_v24  ;;  %vm299_vm4 = vcmp.eq.f32.partialorder %v285_v24, 0.0 }
  0xed   : > { %v287_v32 = vadd.f32 %v283_v30, %v279_v29  ;;  %463 = vrsqrt.f32 %v286_v31  ;;  %vm304_vm5 = vcmp.eq.f32.partialorder %v286_v31, inf  ;;  %v307_v46 = vand.u32 2147483648, %v286_v31 }
  0xee   : > { %vm306_vm6 = vcmp.eq.f32.partialorder %v286_v31, 0.0 }
  0xef   : > { %465 = vrsqrt.f32 %v287_v32  ;;  %vm311_vm7 = vcmp.eq.f32.partialorder %v287_v32, inf  ;;  %v314_v49 = vand.u32 2147483648, %v287_v32  ;;  %vm313_vm8 = vcmp.eq.f32.partialorder %v287_v32, 0.0 }
  0xf6   : > { %v460_v33 = vpop.eup %459 }
  0xf7   : > { %v289_v34 = vmul.f32 %v460_v33, %v284_v19 }
  0xf8   : > { %v462_v36 = vpop.eup %461 }
  0xf9   : > { %v291_v37 = vsel %vm290_vm1, %v284_v19, %v289_v34  ;;  %v296_v39 = vmul.f32 %v462_v36, %v285_v24 }
  0xfa   : > { %v294_v38 = vsel %vm292_vm2, %v293_v35, %v291_v37  ;;  %v464_v41 = vpop.eup %463 }
  0xfb   : > { %316 = vst [vmem:[%s566_s8] sm:$0xff] %v294_v38  ;;  %v298_v42 = vsel %vm297_vm3, %v285_v24, %v296_v39  ;;  %v303_v45 = vmul.f32 %v464_v41, %v286_v31 }
  0xfc   : > { %v466_v43 = vpop.eup %465  ;;  %v301_v44 = vsel %vm299_vm4, %v300_v40, %v298_v42 }
  0xfd   : > { %317 = vst [vmem:[%s566_s8 + $0x8] sm:$0xff] %v301_v44  ;;  %v310_v47 = vmul.f32 %v466_v43, %v287_v32  ;;  %v305_v48 = vsel %vm304_vm5, %v286_v31, %v303_v45  ;;  %326 = sbr.rel (!%p537_p5) target bundleno = 266 (0x10a), region = 55 }
  0xfe   : > { %v308_v50 = vsel %vm306_vm6, %v307_v46, %v305_v48 }
  0xff   : > { %v312_v51 = vsel %vm311_vm7, %v287_v32, %v310_v47  ;;  %318 = vst [vmem:[%s566_s8 + $0x10] sm:$0xff] %v308_v50 }
 0x100   : > { %v315_v52 = vsel %vm313_vm8, %v314_v49, %v312_v51 }
 0x101   : > { %319 = vst [vmem:[%s566_s8 + $0x18] sm:$0xff] %v315_v52 }
 0x102   : > { %v342_v53 = vld [vmem:[%s566_s8] sm:$0xff] }
 0x103   : > { %343 = vst [vmem:[%s329_s18] sm:$0xff] %v342_v53 }
 0x104   : > { %v344_v54 = vld [vmem:[%s566_s8 + $0x8] sm:$0xff] }
 0x105   : > { %345 = vst [vmem:[%s329_s18 + $0x8] sm:$0xff] %v344_v54 }
 0x106   : > { %v346_v55 = vld [vmem:[%s566_s8 + $0x10] sm:$0xff] }
 0x107   : > { %347 = vst [vmem:[%s329_s18 + $0x20] sm:$0xff] %v346_v55 }
 0x108   : > { %v348_v56 = vld [vmem:[%s566_s8 + $0x18] sm:$0xff] }
 0x109   : > { %349 = vst [vmem:[%s329_s18 + $0x28] sm:$0xff] %v348_v56 }
 0x10a PF: > { %p9_p10 = scmp.ge.s32.totalorder %s524_s13, 4   ;;  %s597_s9 = smov %s485_s10 }
 0x10b   : > { %s598_s10 = smov %s535_s16  ;;  %s599_s11 = smov %s524_s13 }
 0x10c   :  { %11 = sbr.rel (!%p9_p10) target bundleno = 2 (0x2), region = 109 }

</bundles_post_ra>
